<compile_context>
chip_gen: v7x
topology: tpu7x:2x2x1
jax: 0.10.0
libtpu: 0.0.40
codegen_flags: <defaults>
</compile_context>

<pallas_src>
import numpy as np

import jax
import jax.numpy as jnp
from jax.experimental import pallas as pl
from jax.experimental.pallas import tpu as pltpu


def _silu(x):
    return x * jax.nn.sigmoid(x)


def _round_up(a, m):
    return ((a + m - 1) // m) * m


def _make_kernel(scale_consts, aw_consts):
    """Build a kernel specialized to the (fixed) adjacency-derived constants."""
    n_nodes = len(scale_consts)
    last = n_nodes - 1
    # Nodes whose silu activation we actually need: the last node (conv2 output
    # that feeds fc_out) plus every node with a nonzero edge into it.
    needed = [j for j in range(n_nodes) if j == last or aw_consts[j] != 0.0]

    def kernel(feat_ref, wt1_ref, win_ref, wt2_ref, wout_ref, b12_ref, bout_ref,
               out_ref):
        feat = feat_ref[...]                      # (Bt, d_feat) = [temb | x | z]

        # --- fused first layer (two zero-padded weights, no lane slicing) ----
        pre_t1 = (jnp.dot(feat, wt1_ref[...], preferred_element_type=jnp.float32)
                  + b12_ref[0:1, :])              # time-MLP layer-1 pre-act
        h0 = jnp.dot(feat, win_ref[...], preferred_element_type=jnp.float32)

        # --- time MLP second layer; b_in + b_t2 folded into one bias row -----
        t1 = _silu(pre_t1)
        hb = (h0
              + jnp.dot(t1, wt2_ref[...], preferred_element_type=jnp.float32)
              + b12_ref[1:2, :])                  # (Bt, H), shared by every node

        # --- graph convolutions, unrolled over nodes, all tensors 2-D --------
        # conv1: every node row of h equals hb, so (A@h)[j] = rowsum(A)[j]*hb and
        #   h1[:, j] = silu(hb * scale[j])  with scale[j] = 1 + rowsum(A)[j]/N.
        # conv2: only node N-1 feeds fc_out, so
        #   h2[:, N-1] = silu(h1[:, N-1] + sum_j aw[j] * h1[:, j]),
        # with aw[j] = A[N-1, j]/N.  Per-node scale/aw are trace-time constants.
        node_act = {}
        for j in needed:
            node_act[j] = _silu(hb * jnp.float32(scale_consts[j]))

        msg = None
        for j in needed:
            w = aw_consts[j]
            if w == 0.0:
                continue
            term = node_act[j] * jnp.float32(w)
            msg = term if msg is None else msg + term

        h_last = node_act[last]
        hl = _silu(h_last + msg) if msg is not None else _silu(h_last)

        # --- fc_out -----------------------------------------------------------
        out = (jnp.dot(hl, wout_ref[...], preferred_element_type=jnp.float32)
               + bout_ref[...])
        out_ref[...] = out.astype(out_ref.dtype)

    return kernel


def pack_params(params, A, d_nodes):
    """One-time packing of the logical Linear params + adjacency constants."""
    W_t1, b_t1 = params["W_t1"], params["b_t1"]      # (td, H), (1, H)
    W_t2, b_t2 = params["W_t2"], params["b_t2"]      # (H, H), (1, H)
    W_in, b_in = params["W_in"], params["b_in"]      # (d_in, H), (1, H)
    W_out, b_out = params["W_out"], params["b_out"]  # (H, d_y), (1, d_y)

    td, H = W_t1.shape
    d_in = W_in.shape[0]
    d_feat = td + d_in

    # Zero-row-padded first-layer weights so a single lane-concatenated
    # [temb | x | z] operand works for both dots (no in-kernel row/lane slices).
    W_t1p = jnp.zeros((d_feat, H), jnp.float32).at[:td, :].set(W_t1)
    W_inp = jnp.zeros((d_feat, H), jnp.float32).at[td:, :].set(W_in)

    # b_t1 in row 0; b_in + b_t2 folded into row 1.
    b12 = jnp.stack([b_t1[0], (b_in + b_t2)[0]], axis=0)  # (2, H)

    # Adjacency-derived constants, baked at pack time (A is fixed per model).
    A = jnp.asarray(A, jnp.float32)
    assert A.shape == (d_nodes, d_nodes)
    rowsum = jnp.sum(A, axis=1)
    scale = 1.0 + rowsum / d_nodes                    # (N,)
    aw = A[d_nodes - 1, :] / d_nodes                  # (N,)
    scale_consts = tuple(float(v) for v in np.asarray(scale))
    aw_consts = tuple(float(v) for v in np.asarray(aw))

    return dict(W_t1p=W_t1p, W_inp=W_inp, W_t2=jnp.asarray(W_t2, jnp.float32),
                W_out=jnp.asarray(W_out, jnp.float32), b12=b12,
                b_out=jnp.asarray(b_out, jnp.float32),
                scale=scale_consts, aw=aw_consts)


def graph_score_net_forward(z, x, t_emb, packed, *, block_b=512):
    """JAX wrapper: concat/pad glue only, all compute inside the Pallas kernel."""
    feat = jnp.concatenate(
        [t_emb.astype(jnp.float32), x.astype(jnp.float32), z.astype(jnp.float32)],
        axis=-1)
    B, d_feat = feat.shape
    H = packed["W_t2"].shape[0]
    d_y = packed["W_out"].shape[1]

    # Batch blocking: pad to a sublane multiple of 8; cap block size so the
    # per-step working set stays small (v7x VMEM) and the grid can shard over
    # both v7x TensorCores.
    assert block_b % 8 == 0
    Bp = _round_up(B, 8)
    Bt = min(block_b, Bp)
    Bp = _round_up(Bp, Bt)
    if Bp != B:
        feat = jnp.pad(feat, ((0, Bp - B), (0, 0)))
    grid = (Bp // Bt,)

    kernel = _make_kernel(packed["scale"], packed["aw"])

    weights = (packed["W_t1p"], packed["W_inp"], packed["W_t2"], packed["W_out"],
               packed["b12"], packed["b_out"])

    n_nodes = len(packed["scale"])
    n_needed = sum(1 for j in range(n_nodes)
                   if j == n_nodes - 1 or packed["aw"][j] != 0.0)
    flops = (2 * Bp * (2 * d_feat * H + H * H + H * d_y)
             + Bp * H * (2 * n_needed + 6))
    transcendentals = Bp * H * (n_needed + 2)
    bytes_accessed = 4 * (Bp * d_feat + Bp * d_y
                          + sum(int(w.size) for w in weights))

    def full_spec(w):
        return pl.BlockSpec(w.shape, lambda i: (0, 0))

    out = pl.pallas_call(
        kernel,
        out_shape=jax.ShapeDtypeStruct((Bp, d_y), jnp.float32),
        grid=grid,
        in_specs=[pl.BlockSpec((Bt, d_feat), lambda i: (i, 0))]
                 + [full_spec(w) for w in weights],
        out_specs=pl.BlockSpec((Bt, d_y), lambda i: (i, 0)),
        compiler_params=pltpu.CompilerParams(
            dimension_semantics=("parallel",)),
        cost_estimate=pl.CostEstimate(flops=flops,
                                      transcendentals=transcendentals,
                                      bytes_accessed=bytes_accessed),
    )(feat, *weights)

    return out[:B]


def graph_score_net_reference(z, x, t_emb, A, params):
    """Pure-JAX reference mirroring the PyTorch forward exactly."""
    xz = jnp.concatenate([x, z], axis=-1)
    h = xz @ params["W_in"] + params["b_in"]                       # (B, H)
    N = A.shape[0]
    h = jnp.repeat(h[:, None, :], N, axis=1)                       # (B, N, H)
    t1 = jax.nn.silu(t_emb @ params["W_t1"] + params["b_t1"])
    te = t1 @ params["W_t2"] + params["b_t2"]
    h = h + te[:, None, :]
    msg = jnp.einsum("ij,bjk->bik", A, h)
    h = jax.nn.silu(h + msg / N)
    msg = jnp.einsum("ij,bjk->bik", A, h)
    h = jax.nn.silu(h + msg / N)
    return h[:, -1] @ params["W_out"] + params["b_out"]


def init_params(key, d_in, time_dim, hidden, d_y):
    """Deterministic PyTorch-Linear-style init (uniform +-1/sqrt(fan_in))."""
    def linear(k, fan_in, fan_out):
        kw, kb = jax.random.split(k)
        bound = 1.0 / jnp.sqrt(fan_in)
        W = jax.random.uniform(kw, (fan_in, fan_out), jnp.float32, -bound, bound)
        b = jax.random.uniform(kb, (1, fan_out), jnp.float32, -bound, bound)
        return W, b

    k1, k2, k3, k4 = jax.random.split(key, 4)
    W_t1, b_t1 = linear(k1, time_dim, hidden)
    W_t2, b_t2 = linear(k2, hidden, hidden)
    W_in, b_in = linear(k3, d_in, hidden)
    W_out, b_out = linear(k4, hidden, d_y)
    return dict(W_t1=W_t1, b_t1=b_t1, W_t2=W_t2, b_t2=b_t2,
                W_in=W_in, b_in=b_in, W_out=W_out, b_out=b_out)


if __name__ == "__main__":
    # small shapes consistent with the module
    B, d_x, d_z = 2, 5, 3
    d_in = d_x + d_z          # fc_in input dim (cat of x and z)
    d_nodes = 8
    d_y = 4
    time_dim = 8
    hidden = 32

    root = jax.random.PRNGKey(0)
    kx, kz, kt, kA1, kA2, kp = jax.random.split(root, 6)

    x = jax.random.normal(kx, (B, d_x), jnp.float32)
    z = jax.random.normal(kz, (B, d_z), jnp.float32)
    t_emb = jax.random.normal(kt, (B, time_dim), jnp.float32)
    params = init_params(kp, d_in, time_dim, hidden, d_y)

    # Case 1: strictly upper-triangular DAG adjacency (last row all zero).
    A_dag = jnp.triu(
        (jax.random.uniform(kA1, (d_nodes, d_nodes)) > 0.5).astype(jnp.float32), k=1
    )
    # Case 2: dense adjacency with a guaranteed-nonzero last row, exercising
    # the conv2 message path (untested by the DAG case).
    A_dense = (jax.random.uniform(kA2, (d_nodes, d_nodes)) > 0.4).astype(jnp.float32)
    A_dense = A_dense.at[d_nodes - 1, 0].set(1.0)

    for name, A in (("dag", A_dag), ("dense", A_dense)):
        packed = jax.tree_util.tree_map(
            lambda v: jax.block_until_ready(v) if isinstance(v, jax.Array) else v,
            pack_params(params, A, d_nodes))
        out = jax.block_until_ready(graph_score_net_forward(z, x, t_emb, packed))
        ref = graph_score_net_reference(z, x, t_emb, A, params)
        assert out.shape == (B, d_y)
        assert jnp.allclose(out, ref, rtol=1e-5, atol=1e-5), (name, out, ref)

    print("KERNEL_OK")
</pallas_src>

<mosaic_0001>
module attributes {stable_mosaic.version = 11 : i64} {
  func.func @kernel(%arg0: i32, %arg1: memref<8x16xf32, #tpu.memory_space<vmem>>, %arg2: memref<16x32xf32, #tpu.memory_space<vmem>>, %arg3: memref<16x32xf32, #tpu.memory_space<vmem>>, %arg4: memref<32x32xf32, #tpu.memory_space<vmem>>, %arg5: memref<32x4xf32, #tpu.memory_space<vmem>>, %arg6: memref<2x32xf32, #tpu.memory_space<vmem>>, %arg7: memref<1x4xf32, #tpu.memory_space<vmem>>, %arg8: memref<8x4xf32, #tpu.memory_space<vmem>>) attributes {dimension_semantics = [#tpu.dimension_semantics<parallel>], iteration_bounds = array<i64: 1>, scalar_prefetch = 0 : i64, scratch_operands = 0 : i64, tpu.core_type = #tpu.core_type<tc>, window_params = [{transform_indices = @transform_0, window_bounds = array<i64: 8, 16>}, {pipeline_mode = #tpu.pipeline_mode<synchronous>, transform_indices = @transform_1, window_bounds = array<i64: 16, 32>}, {pipeline_mode = #tpu.pipeline_mode<synchronous>, transform_indices = @transform_2, window_bounds = array<i64: 16, 32>}, {pipeline_mode = #tpu.pipeline_mode<synchronous>, transform_indices = @transform_3, window_bounds = array<i64: 32, 32>}, {pipeline_mode = #tpu.pipeline_mode<synchronous>, transform_indices = @transform_4, window_bounds = array<i64: 32, 4>}, {pipeline_mode = #tpu.pipeline_mode<synchronous>, transform_indices = @transform_5, window_bounds = array<i64: 2, 32>}, {pipeline_mode = #tpu.pipeline_mode<synchronous>, transform_indices = @transform_6, window_bounds = array<i64: 1, 4>}, {transform_indices = @transform_7, window_bounds = array<i64: 8, 4>}]} {
    %c0 = arith.constant 0 : index
    %c0_0 = arith.constant 0 : index
    %0 = vector.load %arg1[%c0, %c0_0] : memref<8x16xf32, #tpu.memory_space<vmem>>, vector<8x16xf32>
    %c0_1 = arith.constant 0 : index
    %c0_2 = arith.constant 0 : index
    %1 = vector.load %arg2[%c0_1, %c0_2] : memref<16x32xf32, #tpu.memory_space<vmem>>, vector<16x32xf32>
    %cst = arith.constant dense<0.000000e+00> : vector<8x32xf32>
    %2 = tpu.matmul %0, %1, %cst {dimension_numbers = #tpu.dot_dimension_numbers<[1], [0], [0], [1], [0, 0, 1, 1], [], []>} : vector<8x16xf32>, vector<16x32xf32>, vector<8x32xf32> -> vector<8x32xf32>
    %c0_3 = arith.constant 0 : index
    %c0_4 = arith.constant 0 : index
    %3 = vector.load %arg6[%c0_3, %c0_4] : memref<2x32xf32, #tpu.memory_space<vmem>>, vector<1x32xf32>
    %4 = vector.broadcast %3 : vector<1x32xf32> to vector<8x32xf32>
    %5 = arith.addf %2, %4 : vector<8x32xf32>
    %c0_5 = arith.constant 0 : index
    %c0_6 = arith.constant 0 : index
    %6 = vector.load %arg3[%c0_5, %c0_6] : memref<16x32xf32, #tpu.memory_space<vmem>>, vector<16x32xf32>
    %cst_7 = arith.constant dense<0.000000e+00> : vector<8x32xf32>
    %7 = tpu.matmul %0, %6, %cst_7 {dimension_numbers = #tpu.dot_dimension_numbers<[1], [0], [0], [1], [0, 0, 1, 1], [], []>} : vector<8x16xf32>, vector<16x32xf32>, vector<8x32xf32> -> vector<8x32xf32>
    %8 = arith.negf %5 : vector<8x32xf32>
    %9 = math.exp %8 : vector<8x32xf32>
    %cst_8 = arith.constant 1.000000e+00 : f32
    %10 = vector.broadcast %cst_8 : f32 to vector<8x32xf32>
    %11 = arith.addf %10, %9 : vector<8x32xf32>
    %12 = arith.divf %10, %11 : vector<8x32xf32>
    %13 = arith.mulf %5, %12 : vector<8x32xf32>
    %c0_9 = arith.constant 0 : index
    %c0_10 = arith.constant 0 : index
    %14 = vector.load %arg4[%c0_9, %c0_10] : memref<32x32xf32, #tpu.memory_space<vmem>>, vector<32x32xf32>
    %cst_11 = arith.constant dense<0.000000e+00> : vector<8x32xf32>
    %15 = tpu.matmul %13, %14, %cst_11 {dimension_numbers = #tpu.dot_dimension_numbers<[1], [0], [0], [1], [0, 0, 1, 1], [], []>} : vector<8x32xf32>, vector<32x32xf32>, vector<8x32xf32> -> vector<8x32xf32>
    %16 = arith.addf %7, %15 : vector<8x32xf32>
    %c1 = arith.constant 1 : index
    %c0_12 = arith.constant 0 : index
    %17 = vector.load %arg6[%c1, %c0_12] : memref<2x32xf32, #tpu.memory_space<vmem>>, vector<1x32xf32>
    %18 = vector.broadcast %17 : vector<1x32xf32> to vector<8x32xf32>
    %19 = arith.addf %16, %18 : vector<8x32xf32>
    %cst_13 = arith.constant 1.000000e+00 : f32
    %20 = vector.broadcast %cst_13 : f32 to vector<8x32xf32>
    %21 = arith.mulf %19, %20 : vector<8x32xf32>
    %22 = arith.negf %21 : vector<8x32xf32>
    %23 = math.exp %22 : vector<8x32xf32>
    %cst_14 = arith.constant 1.000000e+00 : f32
    %24 = vector.broadcast %cst_14 : f32 to vector<8x32xf32>
    %25 = arith.addf %24, %23 : vector<8x32xf32>
    %26 = arith.divf %24, %25 : vector<8x32xf32>
    %27 = arith.mulf %21, %26 : vector<8x32xf32>
    %28 = arith.negf %27 : vector<8x32xf32>
    %29 = math.exp %28 : vector<8x32xf32>
    %cst_15 = arith.constant 1.000000e+00 : f32
    %30 = vector.broadcast %cst_15 : f32 to vector<8x32xf32>
    %31 = arith.addf %30, %29 : vector<8x32xf32>
    %32 = arith.divf %30, %31 : vector<8x32xf32>
    %33 = arith.mulf %27, %32 : vector<8x32xf32>
    %c0_16 = arith.constant 0 : index
    %c0_17 = arith.constant 0 : index
    %34 = vector.load %arg5[%c0_16, %c0_17] : memref<32x4xf32, #tpu.memory_space<vmem>>, vector<32x4xf32>
    %cst_18 = arith.constant dense<0.000000e+00> : vector<8x4xf32>
    %35 = tpu.matmul %33, %34, %cst_18 {dimension_numbers = #tpu.dot_dimension_numbers<[1], [0], [0], [1], [0, 0, 1, 1], [], []>} : vector<8x32xf32>, vector<32x4xf32>, vector<8x4xf32> -> vector<8x4xf32>
    %c0_19 = arith.constant 0 : index
    %c0_20 = arith.constant 0 : index
    %36 = vector.load %arg7[%c0_19, %c0_20] : memref<1x4xf32, #tpu.memory_space<vmem>>, vector<1x4xf32>
    %37 = vector.broadcast %36 : vector<1x4xf32> to vector<8x4xf32>
    %38 = arith.addf %35, %37 : vector<8x4xf32>
    %c0_21 = arith.constant 0 : index
    %c0_22 = arith.constant 0 : index
    %39 = vector.load %arg8[%c0_21, %c0_22] : memref<8x4xf32, #tpu.memory_space<vmem>>, vector<8x4xf32>
    tpu.vector_store %arg8[%c0_21, %c0_22], %38 {strides = array<i32>} : memref<8x4xf32, #tpu.memory_space<vmem>>, vector<8x4xf32>,
    return
  }
  func.func @transform_0(%arg0: i32) -> (i32, i32) {
    %c0_i32 = arith.constant 0 : i32
    %c0_i32_0 = arith.constant 0 : i32
    return %arg0, %c0_i32 : i32, i32
  }
  func.func @transform_1(%arg0: i32) -> (i32, i32) {
    %c0_i32 = arith.constant 0 : i32
    %c0_i32_0 = arith.constant 0 : i32
    %c0_i32_1 = arith.constant 0 : i32
    return %c0_i32, %c0_i32_0 : i32, i32
  }
  func.func @transform_2(%arg0: i32) -> (i32, i32) {
    %c0_i32 = arith.constant 0 : i32
    %c0_i32_0 = arith.constant 0 : i32
    %c0_i32_1 = arith.constant 0 : i32
    return %c0_i32, %c0_i32_0 : i32, i32
  }
  func.func @transform_3(%arg0: i32) -> (i32, i32) {
    %c0_i32 = arith.constant 0 : i32
    %c0_i32_0 = arith.constant 0 : i32
    %c0_i32_1 = arith.constant 0 : i32
    return %c0_i32, %c0_i32_0 : i32, i32
  }
  func.func @transform_4(%arg0: i32) -> (i32, i32) {
    %c0_i32 = arith.constant 0 : i32
    %c0_i32_0 = arith.constant 0 : i32
    %c0_i32_1 = arith.constant 0 : i32
    return %c0_i32, %c0_i32_0 : i32, i32
  }
  func.func @transform_5(%arg0: i32) -> (i32, i32) {
    %c0_i32 = arith.constant 0 : i32
    %c0_i32_0 = arith.constant 0 : i32
    %c0_i32_1 = arith.constant 0 : i32
    return %c0_i32, %c0_i32_0 : i32, i32
  }
  func.func @transform_6(%arg0: i32) -> (i32, i32) {
    %c0_i32 = arith.constant 0 : i32
    %c0_i32_0 = arith.constant 0 : i32
    %c0_i32_1 = arith.constant 0 : i32
    return %c0_i32, %c0_i32_0 : i32, i32
  }
  func.func @transform_7(%arg0: i32) -> (i32, i32) {
    %c0_i32 = arith.constant 0 : i32
    %c0_i32_0 = arith.constant 0 : i32
    return %arg0, %c0_i32 : i32, i32
  }
}

</mosaic_0001>

<bundles_post_ra>
// kernel: tpu_custom_call.1
= control target key start
LH: loop header
LB: loop body
LE: loop exit
PB: predicated region body
PF: predicated region fallthrough
CT: control target
= control target key end

     0   :  { %12 = vsyncpa [#allocation3], 0  ;;  %s670_s0 = inlined_call_operand.vmem [shape: f32[8,16], index: 0, kind: input, shape index: {}]   ;;  %s671_s1 = inlined_call_operand.hbm [shape: f32[16,32], index: 1, kind: input, shape index: {}]   ;;  %s672_s2 = inlined_call_operand.hbm [shape: f32[16,32], index: 2, kind: input, shape index: {}]   ;;  %s673_s3 = inlined_call_operand.vmem [shape: f32[32,32], index: 3, kind: input, shape index: {}]   ;;  %s674_s4 = inlined_call_operand.vmem [shape: f32[32,4], index: 4, kind: input, shape index: {}]   ;;  %s675_s5 = inlined_call_operand.vmem [shape: f32[2,32], index: 5, kind: input, shape index: {}]   ;;  %s676_s6 = inlined_call_operand.vmem [shape: f32[1,4], index: 6, kind: input, shape index: {}]   ;;  %s677_s7 = inlined_call_operand.vmem [shape: f32[8,4], index: 7, kind: output, shape index: {}]  }
   0x1   :  { %13 = vsyncpa [#allocation5], 0  ;;  %s552_s24 = smov [#allocation2]   ;;  %s504_s28 = scalar_lea.hbm %s671_s1, 256 }
   0x2   :  { %s21_s25 = sshll.u32 %s552_s24, 4  ;;  %p505_p0 = scmp.ne.s32.totalorder %s671_s1, %s504_s28  ;;  %s22_s25 = int_to_ptr.vmem [resolvable:$true] %s21_s25 }
   0x3   :  { %p508_p1 = scmp.lt.u32.totalorder %s504_s28, %s671_s1 }
   0x5   :  { %p510_p2 = pnand %p508_p1, %p505_p0 }
   0x7   :  { %513 = shalt.err (!%p510_p2)
}
   0x8   :  { %s514_s10 = scalar_lea.vmem %s22_s25, 256  ;;  %p519_p4 = scmp.lt.s32.totalorder %s22_s25, %s22_s25 }
   0x9   :  { %p515_p3 = scmp.ne.s32.totalorder %s22_s25, %s514_s10  ;;  %p520_p5 = scmp.lt.s32.totalorder %s514_s10, %s514_s10 }
   0xb   :  { %p521_p6 = por %p520_p5, %p519_p4 }
   0xd   :  { %p522_p7 = pnand %p521_p6, %p515_p3 }
   0xf   :  { %525 = shalt.err (!%p522_p7)
}
  0x10   :  { %s553_s11 = smov 128   ;;  %s554_s12 = smov 8  }
  0x11   :  { %27 = dma.hbm_to_vmem [thread:$0]  %s671_s1, 256, %s22_s25, [#allocation3], %s553_s11, %s553_s11, %s554_s12  }
  0x12   :  { %s555_s15 = smov [#allocation4]   ;;  %s526_s19 = scalar_lea.hbm %s672_s2, 256 }
  0x13   :  { %s33_s16 = sshll.u32 %s555_s15, 4  ;;  %p527_p8 = scmp.ne.s32.totalorder %s672_s2, %s526_s19  ;;  %s34_s16 = int_to_ptr.vmem [resolvable:$true] %s33_s16 }
  0x14   :  { %p530_p9 = scmp.lt.u32.totalorder %s526_s19, %s672_s2 }
  0x16   :  { %p532_p10 = pnand %p530_p9, %p527_p8 }
  0x18   :  { %535 = shalt.err (!%p532_p10)
}
  0x19   :  { %s536_s24 = scalar_lea.vmem %s34_s16, 256  ;;  %p541_p12 = scmp.lt.s32.totalorder %s34_s16, %s34_s16 }
  0x1a   :  { %p537_p11 = scmp.ne.s32.totalorder %s34_s16, %s536_s24  ;;  %p542_p13 = scmp.lt.s32.totalorder %s536_s24, %s536_s24 }
  0x1c   :  { %p543_p0 = por %p542_p13, %p541_p12 }
  0x1e   :  { %p544_p1 = pnand %p543_p0, %p537_p11 }
  0x20   :  { %547 = shalt.err (!%p544_p1)
}
  0x21   :  { %39 = dma.hbm_to_vmem [thread:$0]  %s672_s2, 256, %s34_s16, [#allocation5], %s553_s11, %s553_s11, %s554_s12  }
  0x22   :  { %548 = dma.done.wait [#allocation3], 256  }
  0x23   :  { %549 = vsyncadd [#allocation3], 4294967040 }
  0x24   :  { %550 = dma.done.wait [#allocation5], 256  }
  0x25   :  { %551 = vsyncadd [#allocation5], 4294967040  ;;  %v556_v0 = vmov 0.0|0.0   ;;  %vm557_vm0 = vmmov 0   ;;  %v558_v1 = vmov 0.0   ;;  %v55_v2 = vld [vmem:[#allocation2] sm:$0xff] }
  0x26   :  { %467 = vmatprep.subr.bf16.mxu1 %v556_v0  ;;  %435 = vmatprep.mubr.msk.f32.mxu1 %vm557_vm0, %v558_v1  ;;  %v56_v3 = vld [vmem:[#allocation2 + $0x8] sm:$0xff]  ;;  %v54_v5 = vld [vmem:[%s670_s0] sm:$0xff]  ;;  %vm62_vm1 = vcmask 130048   ;;  %v136_v9 = vld [vmem:[#allocation4] sm:$0xff]  ;;  %vm149_vm2 = vcmask 261120   ;;  %vm397_vm3 = vcmask 31744  }
  0x27   :  { %476 = vmatprep.subr.bf16.mxu0 %v556_v0  ;;  %453 = vmatprep.mubr.msk.f32.mxu0 %vm557_vm0, %v558_v1  ;;  %v468_v4 = vpack.c.bf16 %v56_v3, %v55_v2  ;;  %v145_v6 = vld [vmem:[%s673_s3] sm:$0xff]  ;;  %v146_v7 = vld [vmem:[%s673_s3 + $0x8] sm:$0xff]  ;;  %v137_v10 = vld [vmem:[#allocation4 + $0x8] sm:$0xff] }
  0x28   :  { %v471_v8 = vpack.c.bf16 %v146_v7, %v145_v6  ;;  %v477_v11 = vpack.c.bf16 %v137_v10, %v136_v9  ;;  %v147_v12 = vld [vmem:[%s673_s3 + $0x10] sm:$0xff]  ;;  %v148_v13 = vld [vmem:[%s673_s3 + $0x18] sm:$0xff]  ;;  %v405_v15 = vld [vmem:[%s675_s5] ss:$0 sm:$0xff] }
  0x29   :  { %469 = vmatpush3.bf16.msra.mxu1 %v468_v4  ;;  %v474_v14 = vpack.c.bf16 %v148_v13, %v147_v12  ;;  %v313_v26 = vld [vmem:[%s674_s4] sm:$0xff]  ;;  %v314_v27 = vld [vmem:[%s674_s4 + $0x8] sm:$0xff]  ;;  %v315_v29 = vld [vmem:[%s674_s4 + $0x10] sm:$0xff] }
  0x2a   :  { %470 = vmatprep.subr.bf16.mxu1 %v556_v0  ;;  %478 = vmatpush3.bf16.msra.mxu0 %v477_v11  ;;  %v480_v28 = vpack.c.bf16 %v314_v27, %v313_v26  ;;  %v316_v30 = vld [vmem:[%s674_s4 + $0x18] sm:$0xff]  ;;  %v410_v33 = vld [vmem:[%s675_s5 + $0x1] ss:$0 sm:$0xff]  ;;  %v413_v47 = vld [vmem:[%s676_s6] ss:$0 sm:$0xff] }
  0x2b   :  { %479 = vmatprep.subr.bf16.mxu0 %v556_v0  ;;  %v483_v31 = vpack.c.bf16 %v316_v30, %v315_v29 }
  0x2c   :  { %436 = vmatmul.mubr.msk.f32.vlgmr.msra.gmra.mrb[0].mxu1 %vm62_vm1, %v54_v5 }
  0x2d   :  { %446 = vmatprep.mubr.msk.f32.mxu1 %vm557_vm0, %v558_v1  ;;  %472 = vmatpush3.bf16.msra.mxu1 %v471_v8 }
  0x2e   :  { %473 = vmatprep.subr.bf16.mxu1 %v556_v0  ;;  %454 = vmatmul.mubr.msk.f32.vlgmr.msra.gmra.mrb[0].mxu0 %vm62_vm1, %v54_v5 }
  0x2f   :  { %464 = vmatprep.mubr.msk.f32.mxu0 %vm557_vm0, %v558_v1  ;;  %481 = vmatpush3.bf16.msra.mxu0 %v480_v28 }
  0x30   :  { %482 = vmatprep.subr.bf16.mxu0 %v556_v0 }
  0x31   :  { %475 = vmatpush3.bf16.msra.mxu1 %v474_v14 }
  0x33   :  { %484 = vmatpush3.bf16.msra.mxu0 %v483_v31 }
  0xff   :  { %v132_v16 = vpop.f32.mrb[0].mxu1 }
 0x100   :  { %v133_v17 = vadd.f32 %v405_v15, %v132_v16  ;;  %v437_v18 = vpop.f32.mrb[1].mxu1 }
 0x101   :  { %v289_v24 = vpop.f32.mrb[0].mxu0 }
 0x102   :  { %v407_v19 = vmul.f32 -1.442695, %v133_v17  ;;  %v455_v25 = vpop.f32.mrb[1].mxu0 }
 0x104   :  { %492 = vpow2.f32 %v407_v19 }
 0x10e   :  { %v493_v20 = vpop.eup %492 }
 0x10f   :  { %v141_v21 = vadd.f32 1.0, %v493_v20 }
 0x111   :  { %494 = vrcp.f32 %v141_v21 }
 0x11b   :  { %v495_v22 = vpop.eup %494 }
 0x11c   :  { %v144_v23 = vmul.f32 %v495_v22, %v133_v17 }
 0x11e   :  { %447 = vmatmul.mubr.msk.f32.vlgmr.msra.gmra.mrb[2].mxu1 %vm149_vm2, %v144_v23 }
 0x1f1   :  { %v219_v32 = vpop.f32.mrb[2].mxu1 }
 0x1f2   :  { %v290_v34 = vadd.f32 %v289_v24, %v219_v32  ;;  %v448_v35 = vpop.f32.mrb[3].mxu1 }
 0x1f4   :  { %v298_v36 = vadd.f32 %v410_v33, %v290_v34 }
 0x1f6   :  { %v411_v37 = vmul.f32 -1.442695, %v298_v36 }
 0x1f8   :  { %496 = vpow2.f32 %v411_v37 }
 0x202   :  { %v497_v38 = vpop.eup %496 }
 0x203   :  { %v302_v39 = vadd.f32 1.0, %v497_v38 }
 0x205   :  { %498 = vrcp.f32 %v302_v39 }
 0x20f   :  { %v499_v40 = vpop.eup %498 }
 0x210   :  { %v305_v41 = vmul.f32 %v499_v40, %v298_v36 }
 0x212   :  { %v412_v42 = vmul.f32 -1.442695, %v305_v41 }
 0x214   :  { %500 = vpow2.f32 %v412_v42 }
 0x21e   :  { %v501_v43 = vpop.eup %500 }
 0x21f   :  { %v309_v44 = vadd.f32 1.0, %v501_v43 }
 0x221   :  { %502 = vrcp.f32 %v309_v44 }
 0x22b   :  { %v503_v45 = vpop.eup %502 }
 0x22c   :  { %v312_v46 = vmul.f32 %v503_v45, %v305_v41 }
 0x22e   :  { %465 = vmatmul.mubr.msk.f32.vlgmr.msra.gmra.mrb[2].mxu0 %vm149_vm2, %v312_v46 }
 0x301   :  { %v393_v48 = vpop.f32.mrb[2].mxu0 }
 0x302   :  { %v394_v49 = vadd.f32 %v413_v47, %v393_v48  ;;  %v466_v50 = vpop.f32.mrb[3].mxu0 }
 0x304   :  { %398 = vst.msk [vmem:[%s677_s7] sm:$0xff] %vm397_vm3, %v394_v49 }
 0x305   :  { %403 = vsyncpa [#allocation3], 1 }
 0x306   :  { %404 = vsyncpa [#allocation5], 1 }

</bundles_post_ra>
